<compile_context>
chip_gen: v6e
topology: v6e:2x2x1
jax: 0.10.0
libtpu: 0.0.40
codegen_flags: <defaults>
</compile_context>

<pallas_src>
import jax
import jax.numpy as jnp
from jax import lax
from jax.experimental import pallas as pl
from jax.experimental.pallas import tpu as pltpu

EPS = 1e-5


def _shift_flat(x, offset):
    """shifted[:, i] = x[:, i + offset] if 0 <= i + offset < L else 0 (static offset)."""
    c, l = x.shape
    if offset == 0:
        return x
    pad = jnp.zeros((c, abs(offset)), x.dtype)
    if offset > 0:
        return jnp.concatenate([x[:, offset:], pad], axis=-1)
    return jnp.concatenate([pad, x[:, :l + offset]], axis=-1)


def _conv3x3_bn_relu(x, w_ref, b_ref, cmask_ref, img_w):
    """x: (C, H*W).  w_ref: (Cout, 9*C) BN-scaled taps (K index = tap*C + ci).
    b_ref: (Cout, 1) folded BN bias.  cmask_ref: (3, H*W) column-validity masks
    for dx in {-1, 0, +1}.  Returns relu(w @ im2col(x) + b): (Cout, H*W)."""
    rows = []
    for dy in (-1, 0, 1):
        for dx in (-1, 0, 1):
            sh = _shift_flat(x, dy * img_w + dx)
            if dx != 0:
                sh = sh * cmask_ref[dx + 1:dx + 2, :]   # zero horizontal halo
            rows.append(sh)
    slab = jnp.concatenate(rows, axis=0)                # (9*C, H*W)
    y = jnp.dot(w_ref[...], slab, preferred_element_type=jnp.float32)
    return jnp.maximum(y + b_ref[...], 0.0)


def make_cbr2_kernel(img_w):
    def kernel(x_ref, w1_ref, b1_ref, w2_ref, b2_ref, cmask_ref, out_ref):
        x = x_ref[0]                                                   # (Cin, H*W)
        y1 = _conv3x3_bn_relu(x, w1_ref, b1_ref, cmask_ref, img_w)     # (Cout, H*W)
        y2 = _conv3x3_bn_relu(y1, w2_ref, b2_ref, cmask_ref, img_w)    # (Cout, H*W)
        out_ref[0] = y2.astype(out_ref.dtype)
    return kernel


def cbr2_pallas(x_nchw, w1, g1, b1, m1, v1, w2, g2, b2, m2, v2):
    """x_nchw: (N, Cin, H, W) float32.  Conv weights in PyTorch OIHW layout."""
    N, Cin, H, W = x_nchw.shape
    Cout = w1.shape[0]
    HW = H * W

    # Flatten spatial into the lane dim -- pure reshape, no transpose / pad in HBM.
    x_flat = x_nchw.reshape(N, Cin, HW)

    # OIHW -> (Cout, 9*C) with K index = (ky*3+kx)*C + ci; fold BN scale into the
    # weights and the rest into a per-channel bias (eval-mode BatchNorm).
    def fold(w, g, b, m, v, cin):
        s = g / jnp.sqrt(v + EPS)                                   # (Cout,)
        wf = jnp.transpose(w, (0, 2, 3, 1)).reshape(Cout, 9 * cin)  # (Cout, 9*C)
        return wf * s[:, None], (b - m * s).reshape(Cout, 1)

    w1_eff, t1 = fold(w1, g1, b1, m1, v1, Cin)
    w2_eff, t2 = fold(w2, g2, b2, m2, v2, Cout)

    # Column-validity masks for horizontal taps dx in {-1, 0, +1}.
    w_idx = jnp.arange(HW, dtype=jnp.int32) % W
    cmask = jnp.stack([
        (w_idx >= 1).astype(jnp.float32),          # dx = -1 valid iff w >= 1
        jnp.ones((HW,), jnp.float32),              # dx =  0 always valid
        (w_idx <= W - 2).astype(jnp.float32),      # dx = +1 valid iff w <= W-2
    ], axis=0)                                     # (3, HW)

    bcast = lambda *_: (0, 0)
    out_flat = pl.pallas_call(
        make_cbr2_kernel(W),
        out_shape=jax.ShapeDtypeStruct((N, Cout, HW), jnp.float32),
        grid=(N,),
        in_specs=[
            pl.BlockSpec((1, Cin, HW), lambda n: (n, 0, 0)),   # per-image input slab
            pl.BlockSpec((Cout, 9 * Cin), bcast),              # conv1 taps (BN folded)
            pl.BlockSpec((Cout, 1), bcast),                    # conv1 bias
            pl.BlockSpec((Cout, 9 * Cout), bcast),             # conv2 taps (BN folded)
            pl.BlockSpec((Cout, 1), bcast),                    # conv2 bias
            pl.BlockSpec((3, HW), bcast),                      # column masks
        ],
        out_specs=pl.BlockSpec((1, Cout, HW), lambda n: (n, 0, 0)),
        compiler_params=pltpu.CompilerParams(
            dimension_semantics=("parallel",)),
    )(x_flat, w1_eff, t1, w2_eff, t2, cmask)

    return out_flat.reshape(N, Cout, H, W)


def cbr2_reference(x_nchw, w1, g1, b1, m1, v1, w2, g2, b2, m2, v2):
    """Pure-JAX reference (lax.conv) for correctness checking."""
    dn = ('NCHW', 'OIHW', 'NCHW')

    def bn(y, g, b, m, v):
        g = g[None, :, None, None]
        b = b[None, :, None, None]
        m = m[None, :, None, None]
        v = v[None, :, None, None]
        return g * (y - m) / jnp.sqrt(v + EPS) + b

    y = lax.conv_general_dilated(x_nchw, w1, (1, 1), 'SAME', dimension_numbers=dn)
    y = jnp.maximum(bn(y, g1, b1, m1, v1), 0.0)
    y = lax.conv_general_dilated(y, w2, (1, 1), 'SAME', dimension_numbers=dn)
    y = jnp.maximum(bn(y, g2, b2, m2, v2), 0.0)
    return y


if __name__ == "__main__":
    N, Cin, Cout, H, W = 2, 4, 8, 16, 16

    key = jax.random.PRNGKey(0)
    ks = jax.random.split(key, 11)
    x = jax.random.normal(ks[0], (N, Cin, H, W), jnp.float32)

    w1 = jax.random.normal(ks[1], (Cout, Cin, 3, 3), jnp.float32) * 0.2
    g1 = jax.random.uniform(ks[2], (Cout,), jnp.float32, 0.5, 1.5)
    b1 = jax.random.normal(ks[3], (Cout,), jnp.float32) * 0.1
    m1 = jax.random.normal(ks[4], (Cout,), jnp.float32) * 0.1
    v1 = jax.random.uniform(ks[5], (Cout,), jnp.float32, 0.5, 1.5)

    w2 = jax.random.normal(ks[6], (Cout, Cout, 3, 3), jnp.float32) * 0.2
    g2 = jax.random.uniform(ks[7], (Cout,), jnp.float32, 0.5, 1.5)
    b2 = jax.random.normal(ks[8], (Cout,), jnp.float32) * 0.1
    m2 = jax.random.normal(ks[9], (Cout,), jnp.float32) * 0.1
    v2 = jax.random.uniform(ks[10], (Cout,), jnp.float32, 0.5, 1.5)

    params = (w1, g1, b1, m1, v1, w2, g2, b2, m2, v2)

    out = jax.block_until_ready(cbr2_pallas(x, *params))
    ref = jax.block_until_ready(cbr2_reference(x, *params))

    assert out.shape == (N, Cout, H, W), out.shape
    assert jnp.allclose(out, ref, atol=1e-4, rtol=1e-4), (
        float(jnp.max(jnp.abs(out - ref))))

    print("KERNEL_OK")
</pallas_src>

<mosaic_0001>
module attributes {stable_mosaic.version = 11 : i64} {
  func.func @kernel(%arg0: i32, %arg1: memref<1x4x256xf32, #tpu.memory_space<vmem>>, %arg2: memref<8x36xf32, #tpu.memory_space<vmem>>, %arg3: memref<8x1xf32, #tpu.memory_space<vmem>>, %arg4: memref<8x72xf32, #tpu.memory_space<vmem>>, %arg5: memref<8x1xf32, #tpu.memory_space<vmem>>, %arg6: memref<3x256xf32, #tpu.memory_space<vmem>>, %arg7: memref<1x8x256xf32, #tpu.memory_space<vmem>>) attributes {dimension_semantics = [#tpu.dimension_semantics<parallel>], iteration_bounds = array<i64: 2>, scalar_prefetch = 0 : i64, scratch_operands = 0 : i64, tpu.core_type = #tpu.core_type<tc>, window_params = [{transform_indices = @transform_0, window_bounds = array<i64: 1, 4, 256>}, {pipeline_mode = #tpu.pipeline_mode<synchronous>, transform_indices = @transform_1, window_bounds = array<i64: 8, 36>}, {pipeline_mode = #tpu.pipeline_mode<synchronous>, transform_indices = @transform_2, window_bounds = array<i64: 8, 1>}, {pipeline_mode = #tpu.pipeline_mode<synchronous>, transform_indices = @transform_3, window_bounds = array<i64: 8, 72>}, {pipeline_mode = #tpu.pipeline_mode<synchronous>, transform_indices = @transform_4, window_bounds = array<i64: 8, 1>}, {pipeline_mode = #tpu.pipeline_mode<synchronous>, transform_indices = @transform_5, window_bounds = array<i64: 3, 256>}, {transform_indices = @transform_6, window_bounds = array<i64: 1, 8, 256>}]} {
    %c0 = arith.constant 0 : index
    %c0_0 = arith.constant 0 : index
    %c0_1 = arith.constant 0 : index
    %0 = vector.load %arg1[%c0, %c0_0, %c0_1] : memref<1x4x256xf32, #tpu.memory_space<vmem>>, vector<1x4x256xf32>
    %1 = vector.shape_cast %0 : vector<1x4x256xf32> to vector<4x256xf32>
    %cst = arith.constant 0.000000e+00 : f32
    %2 = vector.broadcast %cst : f32 to vector<4x17xf32>
    %3 = vector.extract_strided_slice %1 {offsets = [0, 0], sizes = [4, 239], strides = [1, 1]} : vector<4x256xf32> to vector<4x239xf32>
    %4 = tpu.concatenate %2, %3 in 1 : vector<4x17xf32>, vector<4x239xf32> -> vector<4x256xf32>
    %c0_2 = arith.constant 0 : index
    %c0_3 = arith.constant 0 : index
    %5 = vector.load %arg6[%c0_2, %c0_3] : memref<3x256xf32, #tpu.memory_space<vmem>>, vector<1x256xf32>
    %6 = vector.broadcast %5 : vector<1x256xf32> to vector<4x256xf32>
    %7 = arith.mulf %4, %6 : vector<4x256xf32>
    %cst_4 = arith.constant 0.000000e+00 : f32
    %8 = vector.broadcast %cst_4 : f32 to vector<4x16xf32>
    %9 = vector.extract_strided_slice %1 {offsets = [0, 0], sizes = [4, 240], strides = [1, 1]} : vector<4x256xf32> to vector<4x240xf32>
    %10 = tpu.concatenate %8, %9 in 1 : vector<4x16xf32>, vector<4x240xf32> -> vector<4x256xf32>
    %cst_5 = arith.constant 0.000000e+00 : f32
    %11 = vector.broadcast %cst_5 : f32 to vector<4x15xf32>
    %12 = vector.extract_strided_slice %1 {offsets = [0, 0], sizes = [4, 241], strides = [1, 1]} : vector<4x256xf32> to vector<4x241xf32>
    %13 = tpu.concatenate %11, %12 in 1 : vector<4x15xf32>, vector<4x241xf32> -> vector<4x256xf32>
    %c2 = arith.constant 2 : index
    %c0_6 = arith.constant 0 : index
    %14 = vector.load %arg6[%c2, %c0_6] : memref<3x256xf32, #tpu.memory_space<vmem>>, vector<1x256xf32>
    %15 = vector.broadcast %14 : vector<1x256xf32> to vector<4x256xf32>
    %16 = arith.mulf %13, %15 : vector<4x256xf32>
    %cst_7 = arith.constant 0.000000e+00 : f32
    %17 = vector.broadcast %cst_7 : f32 to vector<4x1xf32>
    %18 = vector.extract_strided_slice %1 {offsets = [0, 0], sizes = [4, 255], strides = [1, 1]} : vector<4x256xf32> to vector<4x255xf32>
    %19 = tpu.concatenate %17, %18 in 1 : vector<4x1xf32>, vector<4x255xf32> -> vector<4x256xf32>
    %c0_8 = arith.constant 0 : index
    %c0_9 = arith.constant 0 : index
    %20 = vector.load %arg6[%c0_8, %c0_9] : memref<3x256xf32, #tpu.memory_space<vmem>>, vector<1x256xf32>
    %21 = vector.broadcast %20 : vector<1x256xf32> to vector<4x256xf32>
    %22 = arith.mulf %19, %21 : vector<4x256xf32>
    %cst_10 = arith.constant 0.000000e+00 : f32
    %23 = vector.broadcast %cst_10 : f32 to vector<4x1xf32>
    %24 = vector.extract_strided_slice %1 {offsets = [0, 1], sizes = [4, 255], strides = [1, 1]} : vector<4x256xf32> to vector<4x255xf32>
    %25 = tpu.concatenate %24, %23 in 1 : vector<4x255xf32>, vector<4x1xf32> -> vector<4x256xf32>
    %c2_11 = arith.constant 2 : index
    %c0_12 = arith.constant 0 : index
    %26 = vector.load %arg6[%c2_11, %c0_12] : memref<3x256xf32, #tpu.memory_space<vmem>>, vector<1x256xf32>
    %27 = vector.broadcast %26 : vector<1x256xf32> to vector<4x256xf32>
    %28 = arith.mulf %25, %27 : vector<4x256xf32>
    %cst_13 = arith.constant 0.000000e+00 : f32
    %29 = vector.broadcast %cst_13 : f32 to vector<4x15xf32>
    %30 = vector.extract_strided_slice %1 {offsets = [0, 15], sizes = [4, 241], strides = [1, 1]} : vector<4x256xf32> to vector<4x241xf32>
    %31 = tpu.concatenate %30, %29 in 1 : vector<4x241xf32>, vector<4x15xf32> -> vector<4x256xf32>
    %c0_14 = arith.constant 0 : index
    %c0_15 = arith.constant 0 : index
    %32 = vector.load %arg6[%c0_14, %c0_15] : memref<3x256xf32, #tpu.memory_space<vmem>>, vector<1x256xf32>
    %33 = vector.broadcast %32 : vector<1x256xf32> to vector<4x256xf32>
    %34 = arith.mulf %31, %33 : vector<4x256xf32>
    %cst_16 = arith.constant 0.000000e+00 : f32
    %35 = vector.broadcast %cst_16 : f32 to vector<4x16xf32>
    %36 = vector.extract_strided_slice %1 {offsets = [0, 16], sizes = [4, 240], strides = [1, 1]} : vector<4x256xf32> to vector<4x240xf32>
    %37 = tpu.concatenate %36, %35 in 1 : vector<4x240xf32>, vector<4x16xf32> -> vector<4x256xf32>
    %cst_17 = arith.constant 0.000000e+00 : f32
    %38 = vector.broadcast %cst_17 : f32 to vector<4x17xf32>
    %39 = vector.extract_strided_slice %1 {offsets = [0, 17], sizes = [4, 239], strides = [1, 1]} : vector<4x256xf32> to vector<4x239xf32>
    %40 = tpu.concatenate %39, %38 in 1 : vector<4x239xf32>, vector<4x17xf32> -> vector<4x256xf32>
    %c2_18 = arith.constant 2 : index
    %c0_19 = arith.constant 0 : index
    %41 = vector.load %arg6[%c2_18, %c0_19] : memref<3x256xf32, #tpu.memory_space<vmem>>, vector<1x256xf32>
    %42 = vector.broadcast %41 : vector<1x256xf32> to vector<4x256xf32>
    %43 = arith.mulf %40, %42 : vector<4x256xf32>
    %44 = tpu.concatenate %7, %10, %16, %22, %1, %28, %34, %37, %43 in 0 : vector<4x256xf32>, vector<4x256xf32>, vector<4x256xf32>, vector<4x256xf32>, vector<4x256xf32>, vector<4x256xf32>, vector<4x256xf32>, vector<4x256xf32>, vector<4x256xf32> -> vector<36x256xf32>
    %c0_20 = arith.constant 0 : index
    %c0_21 = arith.constant 0 : index
    %45 = vector.load %arg2[%c0_20, %c0_21] : memref<8x36xf32, #tpu.memory_space<vmem>>, vector<8x36xf32>
    %cst_22 = arith.constant dense<0.000000e+00> : vector<8x256xf32>
    %46 = tpu.matmul %45, %44, %cst_22 {dimension_numbers = #tpu.dot_dimension_numbers<[1], [0], [0], [1], [0, 0, 1, 1], [], []>} : vector<8x36xf32>, vector<36x256xf32>, vector<8x256xf32> -> vector<8x256xf32>
    %c0_23 = arith.constant 0 : index
    %c0_24 = arith.constant 0 : index
    %47 = vector.load %arg3[%c0_23, %c0_24] : memref<8x1xf32, #tpu.memory_space<vmem>>, vector<8x1xf32>
    %48 = vector.broadcast %47 : vector<8x1xf32> to vector<8x256xf32>
    %49 = arith.addf %46, %48 : vector<8x256xf32>
    %cst_25 = arith.constant 0.000000e+00 : f32
    %50 = vector.broadcast %cst_25 : f32 to vector<8x256xf32>
    %51 = arith.maximumf %49, %50 : vector<8x256xf32>
    %cst_26 = arith.constant 0.000000e+00 : f32
    %52 = vector.broadcast %cst_26 : f32 to vector<8x17xf32>
    %53 = vector.extract_strided_slice %51 {offsets = [0, 0], sizes = [8, 239], strides = [1, 1]} : vector<8x256xf32> to vector<8x239xf32>
    %54 = tpu.concatenate %52, %53 in 1 : vector<8x17xf32>, vector<8x239xf32> -> vector<8x256xf32>
    %c0_27 = arith.constant 0 : index
    %c0_28 = arith.constant 0 : index
    %55 = vector.load %arg6[%c0_27, %c0_28] : memref<3x256xf32, #tpu.memory_space<vmem>>, vector<1x256xf32>
    %56 = vector.broadcast %55 : vector<1x256xf32> to vector<8x256xf32>
    %57 = arith.mulf %54, %56 : vector<8x256xf32>
    %cst_29 = arith.constant 0.000000e+00 : f32
    %58 = vector.broadcast %cst_29 : f32 to vector<8x16xf32>
    %59 = vector.extract_strided_slice %51 {offsets = [0, 0], sizes = [8, 240], strides = [1, 1]} : vector<8x256xf32> to vector<8x240xf32>
    %60 = tpu.concatenate %58, %59 in 1 : vector<8x16xf32>, vector<8x240xf32> -> vector<8x256xf32>
    %cst_30 = arith.constant 0.000000e+00 : f32
    %61 = vector.broadcast %cst_30 : f32 to vector<8x15xf32>
    %62 = vector.extract_strided_slice %51 {offsets = [0, 0], sizes = [8, 241], strides = [1, 1]} : vector<8x256xf32> to vector<8x241xf32>
    %63 = tpu.concatenate %61, %62 in 1 : vector<8x15xf32>, vector<8x241xf32> -> vector<8x256xf32>
    %c2_31 = arith.constant 2 : index
    %c0_32 = arith.constant 0 : index
    %64 = vector.load %arg6[%c2_31, %c0_32] : memref<3x256xf32, #tpu.memory_space<vmem>>, vector<1x256xf32>
    %65 = vector.broadcast %64 : vector<1x256xf32> to vector<8x256xf32>
    %66 = arith.mulf %63, %65 : vector<8x256xf32>
    %cst_33 = arith.constant 0.000000e+00 : f32
    %67 = vector.broadcast %cst_33 : f32 to vector<8x1xf32>
    %68 = vector.extract_strided_slice %51 {offsets = [0, 0], sizes = [8, 255], strides = [1, 1]} : vector<8x256xf32> to vector<8x255xf32>
    %69 = tpu.concatenate %67, %68 in 1 : vector<8x1xf32>, vector<8x255xf32> -> vector<8x256xf32>
    %c0_34 = arith.constant 0 : index
    %c0_35 = arith.constant 0 : index
    %70 = vector.load %arg6[%c0_34, %c0_35] : memref<3x256xf32, #tpu.memory_space<vmem>>, vector<1x256xf32>
    %71 = vector.broadcast %70 : vector<1x256xf32> to vector<8x256xf32>
    %72 = arith.mulf %69, %71 : vector<8x256xf32>
    %cst_36 = arith.constant 0.000000e+00 : f32
    %73 = vector.broadcast %cst_36 : f32 to vector<8x1xf32>
    %74 = vector.extract_strided_slice %51 {offsets = [0, 1], sizes = [8, 255], strides = [1, 1]} : vector<8x256xf32> to vector<8x255xf32>
    %75 = tpu.concatenate %74, %73 in 1 : vector<8x255xf32>, vector<8x1xf32> -> vector<8x256xf32>
    %c2_37 = arith.constant 2 : index
    %c0_38 = arith.constant 0 : index
    %76 = vector.load %arg6[%c2_37, %c0_38] : memref<3x256xf32, #tpu.memory_space<vmem>>, vector<1x256xf32>
    %77 = vector.broadcast %76 : vector<1x256xf32> to vector<8x256xf32>
    %78 = arith.mulf %75, %77 : vector<8x256xf32>
    %cst_39 = arith.constant 0.000000e+00 : f32
    %79 = vector.broadcast %cst_39 : f32 to vector<8x15xf32>
    %80 = vector.extract_strided_slice %51 {offsets = [0, 15], sizes = [8, 241], strides = [1, 1]} : vector<8x256xf32> to vector<8x241xf32>
    %81 = tpu.concatenate %80, %79 in 1 : vector<8x241xf32>, vector<8x15xf32> -> vector<8x256xf32>
    %c0_40 = arith.constant 0 : index
    %c0_41 = arith.constant 0 : index
    %82 = vector.load %arg6[%c0_40, %c0_41] : memref<3x256xf32, #tpu.memory_space<vmem>>, vector<1x256xf32>
    %83 = vector.broadcast %82 : vector<1x256xf32> to vector<8x256xf32>
    %84 = arith.mulf %81, %83 : vector<8x256xf32>
    %cst_42 = arith.constant 0.000000e+00 : f32
    %85 = vector.broadcast %cst_42 : f32 to vector<8x16xf32>
    %86 = vector.extract_strided_slice %51 {offsets = [0, 16], sizes = [8, 240], strides = [1, 1]} : vector<8x256xf32> to vector<8x240xf32>
    %87 = tpu.concatenate %86, %85 in 1 : vector<8x240xf32>, vector<8x16xf32> -> vector<8x256xf32>
    %cst_43 = arith.constant 0.000000e+00 : f32
    %88 = vector.broadcast %cst_43 : f32 to vector<8x17xf32>
    %89 = vector.extract_strided_slice %51 {offsets = [0, 17], sizes = [8, 239], strides = [1, 1]} : vector<8x256xf32> to vector<8x239xf32>
    %90 = tpu.concatenate %89, %88 in 1 : vector<8x239xf32>, vector<8x17xf32> -> vector<8x256xf32>
    %c2_44 = arith.constant 2 : index
    %c0_45 = arith.constant 0 : index
    %91 = vector.load %arg6[%c2_44, %c0_45] : memref<3x256xf32, #tpu.memory_space<vmem>>, vector<1x256xf32>
    %92 = vector.broadcast %91 : vector<1x256xf32> to vector<8x256xf32>
    %93 = arith.mulf %90, %92 : vector<8x256xf32>
    %94 = tpu.concatenate %57, %60, %66, %72, %51, %78, %84, %87, %93 in 0 : vector<8x256xf32>, vector<8x256xf32>, vector<8x256xf32>, vector<8x256xf32>, vector<8x256xf32>, vector<8x256xf32>, vector<8x256xf32>, vector<8x256xf32>, vector<8x256xf32> -> vector<72x256xf32>
    %c0_46 = arith.constant 0 : index
    %c0_47 = arith.constant 0 : index
    %95 = vector.load %arg4[%c0_46, %c0_47] : memref<8x72xf32, #tpu.memory_space<vmem>>, vector<8x72xf32>
    %cst_48 = arith.constant dense<0.000000e+00> : vector<8x256xf32>
    %96 = tpu.matmul %95, %94, %cst_48 {dimension_numbers = #tpu.dot_dimension_numbers<[1], [0], [0], [1], [0, 0, 1, 1], [], []>} : vector<8x72xf32>, vector<72x256xf32>, vector<8x256xf32> -> vector<8x256xf32>
    %c0_49 = arith.constant 0 : index
    %c0_50 = arith.constant 0 : index
    %97 = vector.load %arg5[%c0_49, %c0_50] : memref<8x1xf32, #tpu.memory_space<vmem>>, vector<8x1xf32>
    %98 = vector.broadcast %97 : vector<8x1xf32> to vector<8x256xf32>
    %99 = arith.addf %96, %98 : vector<8x256xf32>
    %cst_51 = arith.constant 0.000000e+00 : f32
    %100 = vector.broadcast %cst_51 : f32 to vector<8x256xf32>
    %101 = arith.maximumf %99, %100 : vector<8x256xf32>
    %c0_52 = arith.constant 0 : index
    %c0_53 = arith.constant 0 : index
    %c0_54 = arith.constant 0 : index
    %102 = vector.load %arg7[%c0_52, %c0_53, %c0_54] : memref<1x8x256xf32, #tpu.memory_space<vmem>>, vector<1x8x256xf32>
    %103 = vector.shape_cast %102 : vector<1x8x256xf32> to vector<8x256xf32>
    %104 = vector.shape_cast %101 : vector<8x256xf32> to vector<1x8x256xf32>
    tpu.vector_store %arg7[%c0_52, %c0_53, %c0_54], %104 {strides = array<i32>} : memref<1x8x256xf32, #tpu.memory_space<vmem>>, vector<1x8x256xf32>,
    return
  }
  func.func @transform_0(%arg0: i32) -> (i32, i32, i32) {
    %c0_i32 = arith.constant 0 : i32
    %c0_i32_0 = arith.constant 0 : i32
    %c0_i32_1 = arith.constant 0 : i32
    return %arg0, %c0_i32, %c0_i32_0 : i32, i32, i32
  }
  func.func @transform_1(%arg0: i32) -> (i32, i32) {
    %c0_i32 = arith.constant 0 : i32
    %c0_i32_0 = arith.constant 0 : i32
    %c0_i32_1 = arith.constant 0 : i32
    return %c0_i32, %c0_i32_0 : i32, i32
  }
  func.func @transform_2(%arg0: i32) -> (i32, i32) {
    %c0_i32 = arith.constant 0 : i32
    %c0_i32_0 = arith.constant 0 : i32
    %c0_i32_1 = arith.constant 0 : i32
    return %c0_i32, %c0_i32_0 : i32, i32
  }
  func.func @transform_3(%arg0: i32) -> (i32, i32) {
    %c0_i32 = arith.constant 0 : i32
    %c0_i32_0 = arith.constant 0 : i32
    %c0_i32_1 = arith.constant 0 : i32
    return %c0_i32, %c0_i32_0 : i32, i32
  }
  func.func @transform_4(%arg0: i32) -> (i32, i32) {
    %c0_i32 = arith.constant 0 : i32
    %c0_i32_0 = arith.constant 0 : i32
    %c0_i32_1 = arith.constant 0 : i32
    return %c0_i32, %c0_i32_0 : i32, i32
  }
  func.func @transform_5(%arg0: i32) -> (i32, i32) {
    %c0_i32 = arith.constant 0 : i32
    %c0_i32_0 = arith.constant 0 : i32
    %c0_i32_1 = arith.constant 0 : i32
    return %c0_i32, %c0_i32_0 : i32, i32
  }
  func.func @transform_6(%arg0: i32) -> (i32, i32, i32) {
    %c0_i32 = arith.constant 0 : i32
    %c0_i32_0 = arith.constant 0 : i32
    %c0_i32_1 = arith.constant 0 : i32
    return %arg0, %c0_i32, %c0_i32_0 : i32, i32, i32
  }
}

</mosaic_0001>

<bundles_post_ra>
// kernel: tpu_custom_call.1
= control target key start
LH: loop header
LB: loop body
LE: loop exit
PB: predicated region body
PF: predicated region fallthrough
CT: control target
= control target key end

     0   :  { %11 = vsyncpa [#allocation3], 0  ;;  %s1317_s0 = inlined_call_operand.vmem [shape: f32[2,4,256], index: 0, kind: input, shape index: {}]   ;;  %s1318_s1 = inlined_call_operand.hbm [shape: f32[8,36], index: 1, kind: input, shape index: {}]   ;;  %s1319_s2 = inlined_call_operand.vmem [shape: f32[8,1], index: 2, kind: input, shape index: {}]   ;;  %s1320_s3 = inlined_call_operand.hbm [shape: f32[8,72], index: 3, kind: input, shape index: {}]   ;;  %s1321_s4 = inlined_call_operand.vmem [shape: f32[8,1], index: 4, kind: input, shape index: {}]   ;;  %s1322_s5 = inlined_call_operand.vmem [shape: f32[3,256], index: 5, kind: input, shape index: {}]   ;;  %s1323_s6 = inlined_call_operand.hbm [shape: f32[2,8,256], index: 6, kind: output, shape index: {}]  }
   0x1   :  { %12 = vsyncpa [#allocation6], 0 }
   0x2   :  { %13 = vsyncpa [#allocation4], 0 }
   0x3   :  { %15 = vsyncpa [#allocation4 + $0x1], 0  ;;  %s1036_s21 = smov 0   ;;  %s1038_s22 = smov 0  }
   0x4   :  { %s1040_s23 = smov 0   ;;  %s1042_s24 = smov 0  }
   0x5 LB: > { %s1057_s25 = sadd.s32 4294967295, %s986_s24   ;;  %s768_s26 = sadd.s32 4294967294, %s986_s24   ;;  %s986_s24 = sphi %s1042_s24, %s1341_s24   ;;  %s982_s23 = sphi %s1040_s23, %s1340_s23   ;;  %s978_s22 = sphi %s1038_s22, %s1339_s22   ;;  %s974_s21 = sphi %s1036_s21, %s1338_s21  }
   0x6   : > { %s1061_s27 = sadd.s32 1, %s986_s24   ;;  %s159_s28 = sadd.s32 1, %s982_s23 }
   0x7   : > { %s156_s29 = ssub.s32 %s986_s24, %s1061_s27  ;;  %p169_p0 = scmp.ne.s32.totalorder %s982_s23, %s978_s22 }
   0x8   : > { %p157_p1 = scmp.eq.s32.totalorder %s156_s29, 0  ;;  %p170_p2 = scmp.eq.s32.totalorder %s1057_s25, 1 }
   0x9   : > { %p175_p3 = scmp.ne.s32.totalorder %s978_s22, %s974_s21  ;;  %p176_p4 = scmp.eq.s32.totalorder %s768_s26, 1 }
   0xa   : > { %s1072_s30 = scalar_select %p157_p1, %s982_s23, %s159_s28  }
   0xb   : > { %p1074_p5 = por %p170_p2, %p169_p0  ;;  %p1078_p6 = por %p176_p4, %p175_p3 }
   0xc   : > { %p769_p7 = scmp.ge.s32.totalorder %s986_s24, 1  ;;  %p183_p8 = scmp.lt.s32.totalorder %s986_s24, 3 }
   0xd   : > { %s1327_s7 = scalar_select %p1074_p5, 1, 0 }
   0xe   : > { %s1328_s8 = scalar_select %p1078_p6, 1, 0 }
   0xf   : > { %p1324_p9 = scmp.eq.s32.totalorder %s1057_s25, 0  ;;  %p1085_p10 = pnand %p769_p7, %p183_p8 }
  0x10   : > { %s988_s10 = smov [#allocation2]   ;;  %s989_s12 = smov [#allocation5]  }
  0x11   : > { %s1329_s9 = scalar_select %p1085_p10, 1, 0 }
  0x12   : > { %s196_s11 = sshll.u32 %s988_s10, 4  ;;  %p804_p11 = pneg %p1085_p10  ;;  %s197_s11 = int_to_ptr.vmem [resolvable:$true] %s196_s11 }
  0x13   : > { %s210_s13 = sshll.u32 %s989_s12, 4  ;;  %s877_s15 = scalar_lea.vmem %s197_s11, 128  ;;  %s211_s13 = int_to_ptr.vmem [resolvable:$true] %s210_s13 }
  0x14   : > { %p1093_p12 = pnand %p1324_p9, %p804_p11  ;;  %p878_p0 = scmp.ne.s32.totalorder %s197_s11, %s877_s15 }
  0x15   : > { %p885_p3 = scmp.lt.s32.totalorder %s197_s11, %s197_s11  ;;  %p886_p4 = scmp.lt.s32.totalorder %s877_s15, %s877_s15 }
  0x16   : > { %p868_p13 = pneg %p1093_p12 }
  0x17   : > { %p887_p7 = por %p886_p4, %p885_p3 }
  0x18   : > { %p880_p1 = pnand %p878_p0, %p868_p13 }
  0x1a   : > { %p881_p2 = pneg %p880_p1 }
  0x1c   : > { %p888_p8 = pnand %p887_p7, %p881_p2 }
  0x1e   : > { %891 = shalt.err (!%p888_p8)
}
  0x1f   : > { %807 = dma.hbm_to_vmem [thread:$0]  (!%p1093_p12), %s1318_s1, 128, %s197_s11, [#allocation3]  }
  0x20   : > { %s903_s18 = scalar_lea.vmem %s211_s13, 128  ;;  %p911_p0 = scmp.lt.s32.totalorder %s211_s13, %s211_s13 }
  0x21   : > { %p904_p11 = scmp.ne.s32.totalorder %s211_s13, %s903_s18  ;;  %p912_p1 = scmp.lt.s32.totalorder %s903_s18, %s903_s18 }
  0x23   : > { %p906_p9 = pnand %p904_p11, %p868_p13  ;;  %p913_p5 = por %p912_p1, %p911_p0 }
  0x25   : > { %p907_p6 = pneg %p906_p9 }
  0x27   : > { %p914_p10 = pnand %p913_p5, %p907_p6 }
  0x29   : > { %917 = shalt.err (!%p914_p10)
}
  0x2a   : > { %810 = dma.hbm_to_vmem [thread:$0]  (!%p1093_p12), %s1320_s3, 128, %s211_s13, [#allocation6]  }
  0x2b   : > { %p1331_p2 = scmp.ne.s32.totalorder %s1329_s9, 0 }
  0x2c   : > { %p1332_p3 = scmp.eq.s32.totalorder (!%p1331_p2), %s1057_s25, 0 }
  0x2d   : > { %237 = sbr.rel (%p1331_p2) target bundleno = 771 (0x303), region = 44 }
  0x32   : > { %961 = dma.done.wait (%p1332_p3), [#allocation3], 128   ;;  %p1333_p13 = pmov %p1332_p3 }
  0x33   : > { %p1334_p9 = pmov %p1332_p3 }
  0x34   : > { %963 = vsyncadd (%p1333_p13), [#allocation3], 4294967168 }
  0x35   : > { %965 = dma.done.wait (%p1334_p9), [#allocation6], 128   ;;  %p1335_p5 = pmov %p1332_p3 }
  0x36   : > { %p271_p6 = scmp.lt.s32.totalorder %s1057_s25, 1  ;;  %s990_s11 = smov 127   ;;  %v996_v2 = vmov 0.0   ;;  %v997_v3 = vmov 0   ;;  %v419_v4 = vld [vmem:[%s1319_s2] sm:$0xff]  ;;  %v290_v5 = vlaneseq  ;;  %vm379_vm0 = vcmask 908288  }
  0x37   : > { %967 = vsyncadd (%p1335_p5), [#allocation6], 4294967168  ;;  %s991_s12 = smov 111   ;;  %s992_s13 = smov 113   ;;  %499 = vmatprep.mubr.f32.mxu0 %v996_v2  ;;  %661 = vmatprep.mubr.f32.mxu1 %v996_v2  ;;  %vm360_vm1 = vcmask 924672   ;;  %vm371_vm2 = vcmask 916480  }
  0x38   : > { %s272_s26 = scalar_select %p271_p6, %s1057_s25, 1  ;;  %864 = vset.pattern.permute.xlu0 %v997_v3  ;;  %v291_v6 = vshrl.u32 %v290_v5, 7  ;;  %v779_v9 = vld [vmem:[%s1322_s5 + $0x2] ss:$4 sm:$0x3]  ;;  %vm409_vm3 = vcmask 1043456  }
  0x39   : > { %s993_s14 = smov 112   ;;  %s994_s15 = smov 1   ;;  %v288_v14 = vld [vmem:[%s1322_s5] ss:$4 sm:$0x3]  ;;  %vm349_vm4 = vcmask 1039360  }
  0x3a   : > { %s792_s28 = sshll.u32 %s272_s26, 3  ;;  %s995_s16 = smov 15   ;;  %v296_v7 = vsub.s32 1, %v291_v6  ;;  %v292_v8 = vsub.s32 0, %v291_v6  ;;  %vm338_vm5 = vcmask 7168   ;;  %vm314_vm6 = vcmask 121856  }
  0x3b   : > { %s275_s10 = scalar_lea.vmem %s1317_s0, %s792_s28  ;;  %s998_s17 = smov 17   ;;  %vm283_vm7 = vcmask 138240   ;;  %vm306_vm8 = vcmask 130048   ;;  %vm425_vm9 = vcmask 293888   ;;  %vm593_vm11 = vcmask 588800  }
  0x3c   : > { %v1130_v0 = vld [vmem:[%s275_s10] sm:$0xff]  ;;  %s999_s18 = smov 16   ;;  %v1174_v12 = vrot.slane %v779_v9, %v292_v8  ;;  %v1176_v13 = vrot.slane %v779_v9, %v296_v7  ;;  %v1183_v19 = vrot.slane %v288_v14, %v296_v7  ;;  %v1193_v28 = vrot.slane %v288_v14, %v292_v8  ;;  %vm784_vm10 = vmneg %vm306_vm8  ;;  %p1336_p12 = scmp.ne.s32.totalorder %s1327_s7, 0 }
  0x3d   : > { %345 = vrot.lane.b32.xlu1 %v1130_v0, %s990_s11  ;;  %375 = vrot.lane.b32.xlu0 %v1130_v0, %s991_s12  ;;  %v1138_v1 = vcombine.high %v1130_v0, %v1130_v0  ;;  %s1000_s28 = smov [#allocation7]  }
  0x41   : > { %358 = vrot.lane.b32.xlu1 %v1138_v1, %s992_s13  ;;  %377 = vrot.lane.b32.xlu0 %v1138_v1, %s991_s12 }
  0x45   : > { %369 = vrot.lane.b32.xlu1 %v1138_v1, %s993_s14  ;;  %347 = vrot.lane.b32.xlu0 %v1138_v1, %s990_s11 }
  0x49   : > { %367 = vrot.lane.b32.xlu1 %v1130_v0, %s993_s14  ;;  %356 = vrot.lane.b32.xlu0 %v1130_v0, %s992_s13 }
  0x4d   : > { %336 = vrot.lane.b32.xlu1 %v1138_v1, %s994_s15  ;;  %334 = vrot.lane.b32.xlu0 %v1130_v0, %s994_s15 }
  0x51   : > { %312 = vrot.lane.b32.xlu1 %v1138_v1, %s995_s16  ;;  %310 = vrot.lane.b32.xlu0 %v1130_v0, %s995_s16 }
  0x55   : > { %281 = vrot.lane.b32.xlu1 %v1138_v1, %s998_s17  ;;  %279 = vrot.lane.b32.xlu0 %v1130_v0, %s998_s17 }
  0x59   : > { %304 = vrot.lane.b32.xlu1 %v1138_v1, %s999_s18  ;;  %302 = vrot.lane.b32.xlu0 %v1130_v0, %s999_s18 }
  0x5d   : > { %422 = vperm.xlu0 %864, %v419_v4  }
  0xaf   : > { %v346_v10 = vpop.permute.xlu1 %345  ;;  %v376_v11 = vpop.permute.xlu0 %375 }
  0xb3   : > { %v359_v15 = vpop.permute.xlu1 %358  ;;  %v378_v16 = vpop.permute.xlu0 %377 }
  0xb4   : > { %v380_v17 = vsel %vm379_vm0, %v376_v11, %v378_v16  ;;  %v383_v18 = vsel %vm379_vm0, %v378_v16, 0.0  ;;  %v364_v22 = vsel %vm360_vm1, %v359_v15, 0.0  ;;  %v418_v11 = vld [vmem:[#allocation2] sm:$0xff] }
  0xb5   : > { %v384_v20 = vmul.f32 %v380_v17, %v1174_v12  ;;  %v385_v21 = vmul.f32 %v383_v18, %v1176_v13  ;;  %v366_v29 = vmul.f32 %v364_v22, %v1183_v19  ;;  %v587_v22 = vld [vmem:[%s1321_s4] sm:$0xff] }
  0xb7   : > { %v370_v23 = vpop.permute.xlu1 %369  ;;  %780 = vmatprep.subr.msk.mxu0 %vm409_vm3, %v385_v21  ;;  %v348_v24 = vpop.permute.xlu0 %347 }
  0xb8   : > { %v374_v25 = vsel %vm371_vm2, %v370_v23, 0.0  ;;  %v350_v26 = vsel %vm349_vm4, %v346_v10, %v348_v24  ;;  %v353_v27 = vsel %vm349_vm4, %v348_v24, 0.0  ;;  %781 = vmatpush1.msk.msra.mxu0 %vm409_vm3, %v384_v20 }
  0xb9   : > { %v406_v30 = vrot.slane %v374_v25, 4  ;;  %v354_v31 = vmul.f32 %v350_v26, %v1174_v12  ;;  %v355_v32 = vmul.f32 %v353_v27, %v1176_v13 }
  0xbb   : > { %v368_v33 = vpop.permute.xlu1 %367  ;;  %v357_v34 = vpop.permute.xlu0 %356  ;;  %v417_v35 = vsel %vm409_vm3, %v366_v29, %v406_v30  ;;  %v401_v36 = vrot.slane %v355_v32, 4  ;;  %v400_v39 = vrot.slane %v354_v31, 4 }
  0xbc   : > { %v372_v37 = vsel %vm371_vm2, %v368_v33, %v370_v23  ;;  %v361_v38 = vsel %vm360_vm1, %v357_v34, %v359_v15  ;;  %459 = vmatprep.subr.mxu0 %v417_v35 }
  0xbd   : > { %v405_v40 = vrot.slane %v372_v37, 4  ;;  %v365_v41 = vmul.f32 %v361_v38, %v1193_v28  ;;  %v415_v47 = vsel %vm409_vm3, %v1138_v1, %v401_v36  ;;  %v414_v50 = vsel %vm409_vm3, %v1130_v0, %v400_v39 }
  0xbf   : > { %v337_v42 = vpop.permute.xlu1 %336  ;;  %v335_v43 = vpop.permute.xlu0 %334  ;;  %v416_v44 = vsel %vm409_vm3, %v365_v41, %v405_v40 }
  0xc0   : > { %v339_v45 = vsel %vm338_vm5, %v335_v43, %v337_v42  ;;  %v342_v46 = vsel %vm338_vm5, 0.0, %v335_v43  ;;  %460 = vmatpush1.msra.mxu0 %v416_v44 }
  0xc1   : > { %v343_v48 = vmul.f32 %v342_v46, %v1193_v28  ;;  %v344_v49 = vmul.f32 %v339_v45, %v1183_v19  ;;  %461 = vmatprep.subr.mxu0 %v415_v47 }
  0xc2   : > { %462 = vmatpush1.msra.mxu0 %v414_v50 }
  0xc3   : > { %v313_v51 = vpop.permute.xlu1 %312  ;;  %v311_v52 = vpop.permute.xlu0 %310  ;;  %v393_v55 = vrot.slane %v343_v48, 4  ;;  %v394_v56 = vrot.slane %v344_v49, 4 }
  0xc4   : > { %v315_v53 = vsel %vm314_vm6, %v311_v52, %v313_v51  ;;  %v318_v54 = vsel %vm314_vm6, 0.0, %v311_v52 }
  0xc5   : > { %v332_v57 = vmul.f32 %v1174_v12, %v318_v54  ;;  %v333_v58 = vmul.f32 %v1176_v13, %v315_v53 }
  0xc7   : > { %v282_v59 = vpop.permute.xlu1 %281  ;;  %v280_v60 = vpop.permute.xlu0 %279  ;;  %v413_v61 = vsel %vm409_vm3, %v333_v58, %v394_v56  ;;  %v412_v62 = vsel %vm409_vm3, %v332_v57, %v393_v55 }
  0xc8   : > { %463 = vmatprep.subr.mxu0 %v413_v61  ;;  %v284_v63 = vsel %vm283_vm7, %v280_v60, %v282_v59  ;;  %v287_v0 = vsel %vm283_vm7, 0.0, %v280_v60 }
  0xc9   : > { %464 = vmatpush1.msra.mxu0 %v412_v62  ;;  %v300_v5 = vmul.f32 %v1193_v28, %v287_v0  ;;  %v301_v6 = vmul.f32 %v1183_v19, %v284_v63  ;;  %v586_v0 = vld [vmem:[#allocation5] sm:$0xff] }
  0xcb   : > { %v305_v1 = vpop.permute.xlu1 %304  ;;  %v303_v2 = vpop.permute.xlu0 %302 }
  0xcc   : > { %v307_v3 = vsel %vm306_vm8, %v303_v2, %v305_v1  ;;  %v309_v4 = vsel %vm306_vm8, 0.0, %v303_v2 }
  0xcd   : > { %v387_v7 = vrot.slane %v309_v4, 4  ;;  %v388_v8 = vrot.slane %v307_v3, 4 }
  0xcf   : > { %v411_v9 = vsel %vm409_vm3, %v301_v6, %v388_v8  ;;  %v410_v10 = vsel %vm409_vm3, %v300_v5, %v387_v7 }
  0xd0   : > { %465 = vmatprep.subr.mxu0 %v411_v9 }
  0xd1   : > { %466 = vmatpush1.msra.mxu0 %v410_v10 }
  0xd2   : > { %782 = vmatmul.mubr.msk.f32.vlgmr.msra.gmra.mxu0 %vm425_vm9, %v418_v11 }
  0xd8   : > { %v423_v14 = vpop.permute.xlu0 %422 }
 0x192   : > { %v501_v15 = vpop.f32.mrf.mxu0 }
 0x193   : > { %v502_v16 = vadd.f32 %v501_v15, %v423_v14 }
 0x194   : > { %v503_v18 = vpop.f32.mrf.mxu0 }
 0x195   : > { %v1225_v17 = vmax.f32 %v502_v16, 0.0  ;;  %v504_v20 = vadd.f32 %v503_v18, %v423_v14 }
 0x197   : > { %568 = vrot.lane.b32.xlu0 %v1225_v17, %s993_s14  ;;  %576 = vrot.lane.b32.xlu1 %v1225_v17, %s991_s12  ;;  %v507_v21 = vmax.f32 %v504_v20, 0.0 }
 0x19b   : > { %538 = vrot.lane.b32.xlu0 %v1225_v17, %s994_s15  ;;  %558 = vrot.lane.b32.xlu1 %v1225_v17, %s992_s13 }
 0x19f   : > { %560 = vrot.lane.b32.xlu0 %v507_v21, %s992_s13  ;;  %548 = vrot.lane.b32.xlu1 %v1225_v17, %s990_s11 }
 0x1a3   : > { %550 = vrot.lane.b32.xlu0 %v507_v21, %s990_s11  ;;  %578 = vrot.lane.b32.xlu1 %v507_v21, %s991_s12  ;;  %s268_s11 = sand.u32 1, %s978_s22  }
 0x1a4   : > { %s776_s12 = sshll.u32 %s268_s11, 4  ;;  %s673_s20 = scalar_lea.sflag [#allocation4], %s268_s11 }
 0x1a7   : > { %528 = vrot.lane.b32.xlu0 %v1225_v17, %s995_s16  ;;  %570 = vrot.lane.b32.xlu1 %v507_v21, %s993_s14  ;;  %s793_s14 = sshll.u32 %s1057_s25, 8  ;;  %s922_s25 = sshll.u32 %s1000_s28, 4  ;;  %s923_s25 = int_to_ptr.vmem [resolvable:$false] %s922_s25 }
 0x1a8   : > { %s685_s19 = scalar_lea.hbm %s1323_s6, %s793_s14  ;;  %s924_s29 = scalar_lea.vmem %s923_s25, 512 }
 0x1ab   : > { %510 = vrot.lane.b32.xlu0 %v1225_v17, %s998_s17  ;;  %540 = vrot.lane.b32.xlu1 %v507_v21, %s994_s15  ;;  %s270_s15 = scalar_lea.vmem [#allocation7], %s776_s12 }
 0x1af   : > { %520 = vrot.lane.b32.xlu0 %v1225_v17, %s999_s18  ;;  %530 = vrot.lane.b32.xlu1 %v507_v21, %s995_s16  ;;  %s687_s16 = sshll.u32 %s270_s15, 4  ;;  %s688_s16 = int_to_ptr.vmem [resolvable:$true] %s687_s16 }
 0x1b0   : > { %s918_s26 = scalar_lea.vmem %s688_s16, 256  ;;  %p925_p8 = scmp.lt.s32.totalorder %s688_s16, %s923_s25 }
 0x1b1   : > { %p919_p10 = scmp.ne.s32.totalorder %s688_s16, %s918_s26  ;;  %p926_p11 = scmp.lt.s32.totalorder %s924_s29, %s918_s26 }
 0x1b3   : > { %590 = vperm.xlu0 %864, %v587_v22   ;;  %512 = vrot.lane.b32.xlu1 %v507_v21, %s998_s17  ;;  %p920_p4 = pnand %p919_p10, %p1336_p12  ;;  %p927_p0 = por %p926_p11, %p925_p8 }
 0x1b5   : > { %p921_p7 = pneg %p920_p4 }
 0x1b7   : > { %522 = vrot.lane.b32.xlu1 %v507_v21, %s999_s18  ;;  %p928_p1 = pnand %p927_p0, %p921_p7 }
 0x209   : > { %v569_v23 = vpop.permute.xlu0 %568  ;;  %v577_v24 = vpop.permute.xlu1 %576 }
 0x20d   : > { %v539_v25 = vpop.permute.xlu0 %538  ;;  %v559_v26 = vpop.permute.xlu1 %558 }
 0x20e   : > { %v545_v49 = vsel %vm338_vm5, 0.0, %v539_v25 }
 0x20f   : > { %v546_v53 = vmul.f32 %v545_v49, %v1193_v28 }
 0x211   : > { %v561_v27 = vpop.permute.xlu0 %560  ;;  %v549_v29 = vpop.permute.xlu1 %548 }
 0x212   : > { %v565_v36 = vsel %vm360_vm1, %v561_v27, 0.0  ;;  %v562_v37 = vsel %vm360_vm1, %v559_v26, %v561_v27 }
 0x213   : > { %v567_v41 = vmul.f32 %v565_v36, %v1183_v19  ;;  %v566_v43 = vmul.f32 %v562_v37, %v1193_v28 }
 0x215   : > { %v579_v30 = vpop.permute.xlu1 %578  ;;  %v551_v33 = vpop.permute.xlu0 %550 }
 0x216   : > { %v580_v31 = vsel %vm379_vm0, %v577_v24, %v579_v30  ;;  %v583_v32 = vsel %vm379_vm0, %v579_v30, 0.0  ;;  %v555_v39 = vsel %vm349_vm4, %v551_v33, 0.0  ;;  %v552_v42 = vsel %vm349_vm4, %v549_v29, %v551_v33 }
 0x217   : > { %v585_v34 = vmul.f32 %v583_v32, %v1176_v13  ;;  %v584_v35 = vmul.f32 %v580_v31, %v1174_v12  ;;  %v557_v44 = vmul.f32 %v555_v39, %v1176_v13  ;;  %v556_v47 = vmul.f32 %v552_v42, %v1174_v12 }
 0x219   : > { %611 = vmatprep.subr.mxu1 %v585_v34  ;;  %v571_v38 = vpop.permute.xlu1 %570  ;;  %v529_v45 = vpop.permute.xlu0 %528 }
 0x21a   : > { %612 = vmatpush1.msra.mxu1 %v584_v35  ;;  %v572_v40 = vsel %vm371_vm2, %v569_v23, %v571_v38  ;;  %v535_v50 = vsel %vm314_vm6, 0.0, %v529_v45 }
 0x21b   : > { %783 = vmatprep.subr.msk.mxu1 %vm371_vm2, %v571_v38  ;;  %v536_v57 = vmul.f32 %v535_v50, %v1174_v12 }
 0x21c   : > { %614 = vmatpush1.msra.mxu1 %v572_v40 }
 0x21d   : > { %615 = vmatprep.subr.mxu1 %v567_v41  ;;  %v541_v46 = vpop.permute.xlu1 %540  ;;  %v511_v55 = vpop.permute.xlu0 %510 }
 0x21e   : > { %v542_v48 = vsel %vm338_vm5, %v539_v25, %v541_v46  ;;  %616 = vmatpush1.msra.mxu1 %v566_v43  ;;  %v517_v60 = vsel %vm283_vm7, 0.0, %v511_v55 }
 0x21f   : > { %617 = vmatprep.subr.mxu1 %v557_v44  ;;  %v547_v51 = vmul.f32 %v542_v48, %v1183_v19  ;;  %v518_v12 = vmul.f32 %v517_v60, %v1193_v28 }
 0x220   : > { %618 = vmatpush1.msra.mxu1 %v556_v47 }
 0x221   : > { %619 = vmatprep.subr.mxu1 %v507_v21  ;;  %v531_v52 = vpop.permute.xlu1 %530  ;;  %v521_v61 = vpop.permute.xlu0 %520 }
 0x222   : > { %v532_v54 = vsel %vm314_vm6, %v529_v45, %v531_v52  ;;  %620 = vmatpush1.msra.mxu1 %v1225_v17 }
 0x223   : > { %v537_v56 = vmul.f32 %v532_v54, %v1176_v13  ;;  %621 = vmatprep.subr.mxu1 %v547_v51 }
 0x224   : > { %622 = vmatpush1.msra.mxu1 %v546_v53 }
 0x225   : > { %623 = vmatprep.subr.mxu1 %v537_v56  ;;  %v513_v58 = vpop.permute.xlu1 %512 }
 0x226   : > { %624 = vmatpush1.msra.mxu1 %v536_v57  ;;  %v514_v59 = vsel %vm283_vm7, %v511_v55, %v513_v58 }
 0x227   : > { %v519_v13 = vmul.f32 %v514_v59, %v1183_v19 }
 0x229   : > { %v523_v62 = vpop.permute.xlu1 %522 }
 0x22a   : > { %v524_v63 = vsel %vm306_vm8, %v521_v61, %v523_v62 }
 0x22b   : > { %625 = vmatprep.subr.mxu1 %v524_v63 }
 0x22c   : > { %785 = vmatpush1.msk.msra.mxu1 %vm784_vm10, %v521_v61 }
 0x22d   : > { %627 = vmatprep.subr.mxu1 %v519_v13 }
 0x22e   : > { %628 = vmatpush1.msra.mxu1 %v518_v12  ;;  %v591_v1 = vpop.permute.xlu0 %590 }
 0x22f   : > { %786 = vmatmul.mubr.msk.f32.vlgmr.msra.gmra.mxu1 %vm593_vm11, %v586_v0 }
 0x2ef   : > { %v663_v2 = vpop.f32.mrf.mxu1 }
 0x2f0   : > { %v664_v3 = vadd.f32 %v663_v2, %v591_v1 }
 0x2f1   : > { %v665_v4 = vpop.f32.mrf.mxu1 }
 0x2f2   : > { %v668_v19 = vmax.f32 %v664_v3, 0.0  ;;  %v666_v5 = vadd.f32 %v665_v4, %v591_v1 }
 0x2f4   : > { %670 = vst [vmem:[%s270_s15] sm:$0xff] %v668_v19  ;;  %v669_v28 = vmax.f32 %v666_v5, 0.0 }
 0x2f6   : > { %671 = vst [vmem:[%s270_s15 + $0x8] sm:$0xff] %v669_v28 }
 0x2f7   : > { %931 = shalt.err (!%p928_p1)
}
 0x2f8   : > { %s932_s9 = scalar_lea.hbm %s685_s19, 256  ;;  %s936_s11 = scalar_lea.hbm %s1323_s6, 512 }
 0x2f9   : > { %p933_p2 = scmp.ne.s32.totalorder %s685_s19, %s932_s9  ;;  %p937_p9 = scmp.lt.s32.totalorder %s685_s19, %s1323_s6 }
 0x2fa   : > { %p938_p5 = scmp.lt.s32.totalorder %s936_s11, %s932_s9 }
 0x2fb   : > { %p934_p3 = pnand %p933_p2, %p1336_p12 }
 0x2fc   : > { %p939_p6 = por %p938_p5, %p937_p9 }
 0x2fd   : > { %p935_p13 = pneg %p934_p3 }
 0x2ff   : > { %p940_p10 = pnand %p939_p6, %p935_p13 }
 0x301   : > { %943 = shalt.err (!%p940_p10)
}
 0x302   : > { %802 = dma.vmem_to_hbm [thread:$0]  (%p1336_p12), %s688_s16, 256, %s685_s19, %s673_s20  }
 0x303 PF: > { %p819_p4 = scmp.ge.s32.totalorder %s986_s24, 2  ;;  %s699_s15 = sand.u32 1, %s974_s21  }
 0x304   : > { %p1337_p7 = scmp.ne.s32.totalorder %s1328_s8, 0  ;;  %s700_s17 = scalar_lea.sflag [#allocation4], %s699_s15 }
 0x306   : > { %p812_p8 = pnand %p819_p4, %p1337_p7 }
 0x308   : > { %p813_p11 = pneg %p812_p8 }
 0x30a   : > { %969 = dma.done.wait (%p813_p11), %s700_s17, 256  }
 0x30b   : > { %971 = vsyncadd (%p813_p11), %s700_s17, 4294967040  ;;  %p18_p0 = scmp.ge.s32.totalorder %s1061_s27, 4   ;;  %s1338_s21 = smov %s978_s22 }
 0x30c   : > { %s1339_s22 = smov %s982_s23  ;;  %s1340_s23 = smov %s1072_s30 }
 0x30d   : > { %s1341_s24 = smov %s1061_s27  ;;  %20 = sbr.rel (!%p18_p0) target bundleno = 5 (0x5), region = 89 }
 0x312   :  { %705 = vsyncpa [#allocation3], 1 }
 0x313   :  { %707 = vsyncpa [#allocation3 + $0x1], 1 }
 0x314   :  { %708 = vsyncpa [#allocation6], 1 }
 0x315   :  { %709 = vsyncpa [#allocation4], 1 }
 0x316   :  { %711 = vsyncpa [#allocation4 + $0x1], 1 }

</bundles_post_ra>
